<compile_context>
chip_gen: v7x
topology: tpu7x:2x2x1
jax: 0.10.0
libtpu: 0.0.40
codegen_flags: <defaults>
</compile_context>

<pallas_src>
import functools

import jax
import jax.numpy as jnp
from jax import lax
from jax.experimental import pallas as pl
from jax.experimental.pallas import tpu as pltpu


def _round_up(v, m):
    return ((v + m - 1) // m) * m


# --------------------------------------------------------------------------
# Kernel
# --------------------------------------------------------------------------
def _mol_kernel(x_ref, w_ref, b_ref, o_ref, *, k, mu_cols, sig_cols,
                sig_min, sig_max):
    # Single fused matmul for pi | mu | sigma (+ zero padding columns).
    # x/w are bf16 (or f32); accumulate in f32, epilogue in f32.
    y = (jnp.dot(x_ref[...], w_ref[...], preferred_element_type=jnp.float32)
         + b_ref[...])                                              # [TM, W_pad] f32

    w_pad = o_ref.shape[-1]
    # (1, W_pad) column-id mask, broadcast in the wheres (cheaper on v5e VALU).
    col = lax.broadcasted_iota(jnp.int32, (1, w_pad), 1)
    mu_end = k + mu_cols
    sig_end = mu_end + sig_cols
    is_pi = col < k
    is_sig = (col >= mu_end) & (col < sig_end)

    # ---- pi: softmax over the first k columns only (lane-masked) ----
    neg_inf = jnp.float32(-jnp.inf)
    pi_masked = jnp.where(is_pi, y, neg_inf)
    m = jnp.max(pi_masked, axis=-1, keepdims=True)                  # [TM, 1]
    e = jnp.exp(jnp.where(is_pi, y - m, neg_inf))                   # 0 outside pi lanes
    denom = jnp.sum(e, axis=-1, keepdims=True)                      # [TM, 1]
    pi_vals = e * pl.reciprocal(denom, approx=False)                # exact: free (mem-bound)

    # ---- sigma: range squashing (selected into the sigma lanes below) ----
    if sig_max is None:
        # Clamp non-sigma lanes to 0 before exp so mu lanes can't overflow to inf.
        sig_vals = sig_min + jnp.exp(jnp.where(is_sig, y, jnp.float32(0.0)))
    else:
        sig_vals = sig_min + (sig_max - sig_min) * jax.nn.sigmoid(y)

    # ---- single lane-dense store: pi | mu | sigma_expanded | (zero pad) ----
    o_ref[...] = jnp.where(is_pi, pi_vals,
                           jnp.where(is_sig, sig_vals, y)).astype(o_ref.dtype)


# --------------------------------------------------------------------------
# Parameter fusion (call ONCE, outside the per-forward path)
# --------------------------------------------------------------------------
def fuse_params(params, *, k, y_dim, share_sig=True, matmul_dtype=jnp.bfloat16):
    """Fold fc_pi / fc_mu / fc_sigma into one lane-dense padded weight & bias.

    For SHARE_SIG=True the k sigma columns are replicated to k*y_dim width here
    (column i*y_dim + j == original column i), which is exactly
    sigma.unsqueeze(-1).expand_as(mu) folded into the weights, so the kernel's
    output slab already holds the fully-expanded sigma.
    """
    w_sig, b_sig = params["w_sig"], params["b_sig"]
    if share_sig:
        w_sig = jnp.repeat(w_sig, y_dim, axis=1)
        b_sig = jnp.repeat(b_sig, y_dim, axis=1)
    w_fused = jnp.concatenate([params["w_pi"], params["w_mu"], w_sig], axis=1)
    b_fused = jnp.concatenate([params["b_pi"], params["b_mu"], b_sig], axis=1)
    W = w_fused.shape[1]
    W_pad = _round_up(W, 128)                 # lane-dense slab / unmasked vst
    if W_pad > W:
        w_fused = jnp.pad(w_fused, ((0, 0), (0, W_pad - W)))
        b_fused = jnp.pad(b_fused, ((0, 0), (0, W_pad - W)))
    return w_fused.astype(matmul_dtype), b_fused.astype(jnp.float32)


# --------------------------------------------------------------------------
# Forward wrapper
# --------------------------------------------------------------------------
def mixture_of_logits_forward(x, fused_params, *, k, y_dim,
                              sig_min=1e-4, sig_max=10.0,
                              tm=1024, out_dtype=jnp.float32):
    """x: [N, in_dim].  fused_params: output of `fuse_params` (precomputed once).

    Returns dict(pi=[N,k], mu=[N,k,y_dim], sigma=[N,k,y_dim]) matching
    MixtureOfLogits.forward.
    """
    w_fused, b_fused = fused_params
    N, D = x.shape
    W_pad = w_fused.shape[1]
    mu_cols = k * y_dim
    sig_cols = k * y_dim                      # sigma already expanded in fuse_params

    # bf16 matmul stream (ideally the upstream layer emits bf16 directly; this
    # cast is a no-op in that case).
    x = x.astype(w_fused.dtype)

    # Row tiling: multiple of 8, large enough to amortize per-step overhead but
    # split so the grid has >= 2 steps when possible (v7x dual-TC sharding).
    tm_req = max(8, _round_up(int(tm), 8))
    if N <= 2 * tm_req:
        tm_eff = min(tm_req, max(8, _round_up(-(-N // 2), 8)))
    else:
        tm_eff = tm_req
    grid = (pl.cdiv(N, tm_eff),)              # ragged last block handled by Pallas

    kernel = functools.partial(
        _mol_kernel, k=k, mu_cols=mu_cols, sig_cols=sig_cols,
        sig_min=float(sig_min),
        sig_max=None if sig_max is None else float(sig_max))

    out = pl.pallas_call(
        kernel,
        out_shape=jax.ShapeDtypeStruct((N, W_pad), out_dtype),
        grid_spec=pl.GridSpec(
            grid=grid,
            in_specs=[
                pl.BlockSpec((tm_eff, D), lambda i: (i, 0)),   # x tiles (pipelined)
                pl.BlockSpec((D, W_pad), lambda i: (0, 0)),    # fused weight (grid-invariant)
                pl.BlockSpec((1, W_pad), lambda i: (0, 0)),    # fused bias (grid-invariant)
            ],
            out_specs=pl.BlockSpec((tm_eff, W_pad), lambda i: (i, 0)),
        ),
        compiler_params=pltpu.CompilerParams(
            dimension_semantics=("parallel",),
            vmem_limit_bytes=32 * 1024 * 1024),
    )(x, w_fused, b_fused)

    # Layout glue only (contiguous slices / reshape, no broadcast materialization).
    # TODO(synk): a downstream MoL loss could consume `out` (the fused slab)
    # directly and skip these slice copies entirely.
    pi = out[:, :k]
    mu = out[:, k:k + mu_cols].reshape(N, k, y_dim)
    sigma = out[:, k + mu_cols:k + mu_cols + sig_cols].reshape(N, k, y_dim)
    return {"pi": pi, "mu": mu, "sigma": sigma}


# --------------------------------------------------------------------------
# Init + pure-JAX reference (for the self-check)
# --------------------------------------------------------------------------
def init_params(key, in_dim, k, y_dim, share_sig=True, mu_min=-3.0, mu_max=3.0):
    """Mirrors kaiming_normal weights / zero biases, uniform(mu_min, mu_max)
    bias on fc_mu (MixtureLogitNetwork.init_param)."""
    k1, k2, k3, k4 = jax.random.split(key, 4)
    std = jnp.sqrt(2.0 / in_dim)
    sig_out = k if share_sig else k * y_dim
    return {
        "w_pi": std * jax.random.normal(k1, (in_dim, k), jnp.float32),
        "b_pi": jnp.zeros((1, k), jnp.float32),
        "w_mu": std * jax.random.normal(k2, (in_dim, k * y_dim), jnp.float32),
        "b_mu": jax.random.uniform(k4, (1, k * y_dim), jnp.float32,
                                   minval=mu_min, maxval=mu_max),
        "w_sig": std * jax.random.normal(k3, (in_dim, sig_out), jnp.float32),
        "b_sig": jnp.zeros((1, sig_out), jnp.float32),
    }


def _reference_forward(x, params, *, k, y_dim, sig_min, sig_max, share_sig,
                       matmul_dtype=jnp.bfloat16):
    """Pure-JAX reference of MixtureOfLogits.forward (same bf16 matmul numerics)."""
    N = x.shape[0]
    xc = x.astype(matmul_dtype)

    def lin(w, b):
        return (jnp.dot(xc, w.astype(matmul_dtype),
                        preferred_element_type=jnp.float32)
                + b.astype(jnp.float32))

    pi = jax.nn.softmax(lin(params["w_pi"], params["b_pi"]), axis=1)
    mu = lin(params["w_mu"], params["b_mu"]).reshape(N, k, y_dim)
    s = lin(params["w_sig"], params["b_sig"])
    if share_sig:
        s = jnp.broadcast_to(s[:, :, None], (N, k, y_dim))
    else:
        s = s.reshape(N, k, y_dim)
    if sig_max is None:
        sigma = sig_min + jnp.exp(s)
    else:
        sigma = sig_min + (sig_max - sig_min) * jax.nn.sigmoid(s)
    return {"pi": pi, "mu": mu, "sigma": sigma}


def _check(x, params, *, k, y_dim, sig_min, sig_max, share_sig, tm=1024):
    fused = fuse_params(params, k=k, y_dim=y_dim, share_sig=share_sig)
    out = mixture_of_logits_forward(x, fused, k=k, y_dim=y_dim,
                                    sig_min=sig_min, sig_max=sig_max, tm=tm)
    jax.block_until_ready(out)
    ref = _reference_forward(x, params, k=k, y_dim=y_dim,
                             sig_min=sig_min, sig_max=sig_max,
                             share_sig=share_sig)
    for name in ("pi", "mu", "sigma"):
        assert out[name].shape == ref[name].shape, name
        assert jnp.allclose(out[name], ref[name], atol=1e-4, rtol=1e-4), name
    return out


if __name__ == "__main__":
    # Shapes consistent with the module: in_dim = last hidden dim (128),
    # y_dim = 10, k = 5, SHARE_SIG = True, sig_min = 1e-4, sig_max = 10.
    IN_DIM, K, Y_DIM = 128, 5, 10
    key = jax.random.PRNGKey(0)
    kx, kp, kx2 = jax.random.split(key, 3)
    params = init_params(kp, IN_DIM, K, Y_DIM, share_sig=True)

    # Small batch (module example: batch=2).
    x = jax.random.uniform(kx, (2, IN_DIM), jnp.float32)
    out = _check(x, params, k=K, y_dim=Y_DIM,
                 sig_min=1e-4, sig_max=10.0, share_sig=True)
    assert out["pi"].shape == (2, K)
    assert out["mu"].shape == (2, K, Y_DIM)
    assert out["sigma"].shape == (2, K, Y_DIM)

    # sig_max=None (exp path).
    _check(x, params, k=K, y_dim=Y_DIM,
           sig_min=1e-4, sig_max=None, share_sig=True)

    # Larger ragged batch -> exercises cdiv grid with a partial last block and
    # multi-step pipelining.
    x2 = jax.random.uniform(kx2, (100, IN_DIM), jnp.float32)
    _check(x2, params, k=K, y_dim=Y_DIM,
           sig_min=1e-4, sig_max=10.0, share_sig=True, tm=64)

    # SHARE_SIG=False path.
    params_ns = init_params(kp, IN_DIM, K, Y_DIM, share_sig=False)
    _check(x, params_ns, k=K, y_dim=Y_DIM,
           sig_min=1e-4, sig_max=10.0, share_sig=False)

    print("KERNEL_OK")
</pallas_src>

<mosaic_0001>
module attributes {stable_mosaic.version = 11 : i64} {
  func.func @_mol_kernel(%arg0: i32, %arg1: memref<8x128xbf16, #tpu.memory_space<vmem>>, %arg2: memref<128x128xbf16, #tpu.memory_space<vmem>>, %arg3: memref<1x128xf32, #tpu.memory_space<vmem>>, %arg4: memref<8x128xf32, #tpu.memory_space<vmem>>) attributes {dimension_semantics = [#tpu.dimension_semantics<parallel>], iteration_bounds = array<i64: 1>, scalar_prefetch = 0 : i64, scratch_operands = 0 : i64, tpu.core_type = #tpu.core_type<tc>, window_params = [{transform_indices = @transform_0, window_bounds = array<i64: 8, 128>}, {pipeline_mode = #tpu.pipeline_mode<synchronous>, transform_indices = @transform_1, window_bounds = array<i64: 128, 128>}, {pipeline_mode = #tpu.pipeline_mode<synchronous>, transform_indices = @transform_2, window_bounds = array<i64: 1, 128>}, {transform_indices = @transform_3, window_bounds = array<i64: 8, 128>}]} {
    %c0 = arith.constant 0 : index
    %c0_0 = arith.constant 0 : index
    %0 = vector.load %arg1[%c0, %c0_0] : memref<8x128xbf16, #tpu.memory_space<vmem>>, vector<8x128xbf16>
    %c0_1 = arith.constant 0 : index
    %c0_2 = arith.constant 0 : index
    %1 = vector.load %arg2[%c0_1, %c0_2] : memref<128x128xbf16, #tpu.memory_space<vmem>>, vector<128x128xbf16>
    %cst = arith.constant dense<0.000000e+00> : vector<8x128xf32>
    %2 = tpu.matmul %0, %1, %cst {dimension_numbers = #tpu.dot_dimension_numbers<[1], [0], [0], [1], [0, 0, 1, 1], [], []>} : vector<8x128xbf16>, vector<128x128xbf16>, vector<8x128xf32> -> vector<8x128xf32>
    %c0_3 = arith.constant 0 : index
    %c0_4 = arith.constant 0 : index
    %3 = vector.load %arg3[%c0_3, %c0_4] : memref<1x128xf32, #tpu.memory_space<vmem>>, vector<1x128xf32>
    %4 = vector.broadcast %3 : vector<1x128xf32> to vector<8x128xf32>
    %5 = arith.addf %2, %4 : vector<8x128xf32>
    %6 = tpu.iota {dimensions = array<i32: 1>} : vector<1x128xi32>
    %c5_i32 = arith.constant 5 : i32
    %7 = vector.broadcast %c5_i32 : i32 to vector<1x128xi32>
    %8 = arith.cmpi slt, %6, %7 : vector<1x128xi32>
    %c55_i32 = arith.constant 55 : i32
    %9 = vector.broadcast %c55_i32 : i32 to vector<1x128xi32>
    %10 = arith.cmpi sge, %6, %9 : vector<1x128xi32>
    %c105_i32 = arith.constant 105 : i32
    %11 = vector.broadcast %c105_i32 : i32 to vector<1x128xi32>
    %12 = arith.cmpi slt, %6, %11 : vector<1x128xi32>
    %13 = arith.andi %10, %12 : vector<1x128xi1>
    %cst_5 = arith.constant 0xFF800000 : f32
    %14 = vector.shape_cast %8 : vector<1x128xi1> to vector<1x128xi1>
    %15 = vector.broadcast %14 : vector<1x128xi1> to vector<8x128xi1>
    %16 = vector.broadcast %cst_5 : f32 to vector<8x128xf32>
    %17 = arith.select %15, %5, %16 : vector<8x128xi1>, vector<8x128xf32>
    %cst_6 = arith.constant dense<0xFF800000> : vector<8xf32>
    %18 = vector.multi_reduction <maximumf>, %17, %cst_6 [1] : vector<8x128xf32> to vector<8xf32>
    %19 = vector.shape_cast %18 : vector<8xf32> to vector<8x1xf32>
    %20 = vector.broadcast %19 : vector<8x1xf32> to vector<8x128xf32>
    %21 = arith.subf %5, %20 : vector<8x128xf32>
    %cst_7 = arith.constant 0xFF800000 : f32
    %22 = vector.shape_cast %8 : vector<1x128xi1> to vector<1x128xi1>
    %23 = vector.broadcast %22 : vector<1x128xi1> to vector<8x128xi1>
    %24 = vector.broadcast %cst_7 : f32 to vector<8x128xf32>
    %25 = arith.select %23, %21, %24 : vector<8x128xi1>, vector<8x128xf32>
    %26 = math.exp %25 : vector<8x128xf32>
    %cst_8 = arith.constant dense<0.000000e+00> : vector<8xf32>
    %27 = vector.multi_reduction <add>, %26, %cst_8 [1] : vector<8x128xf32> to vector<8xf32>
    %28 = vector.shape_cast %27 : vector<8xf32> to vector<8x1xf32>
    %29 = tpu.reciprocal %28 : vector<8x1xf32> -> vector<8x1xf32>
    %30 = vector.broadcast %29 : vector<8x1xf32> to vector<8x128xf32>
    %31 = arith.mulf %26, %30 : vector<8x128xf32>
    %32 = arith.negf %5 : vector<8x128xf32>
    %33 = math.exp %32 : vector<8x128xf32>
    %cst_9 = arith.constant 1.000000e+00 : f32
    %34 = vector.broadcast %cst_9 : f32 to vector<8x128xf32>
    %35 = arith.addf %34, %33 : vector<8x128xf32>
    %36 = arith.divf %34, %35 : vector<8x128xf32>
    %cst_10 = arith.constant 9.99989986 : f32
    %37 = vector.broadcast %cst_10 : f32 to vector<8x128xf32>
    %38 = arith.mulf %37, %36 : vector<8x128xf32>
    %cst_11 = arith.constant 9.99999974E-5 : f32
    %39 = vector.broadcast %cst_11 : f32 to vector<8x128xf32>
    %40 = arith.addf %39, %38 : vector<8x128xf32>
    %41 = vector.shape_cast %13 : vector<1x128xi1> to vector<1x128xi1>
    %42 = vector.broadcast %41 : vector<1x128xi1> to vector<8x128xi1>
    %43 = arith.select %42, %40, %5 : vector<8x128xi1>, vector<8x128xf32>
    %44 = vector.shape_cast %8 : vector<1x128xi1> to vector<1x128xi1>
    %45 = vector.broadcast %44 : vector<1x128xi1> to vector<8x128xi1>
    %46 = arith.select %45, %31, %43 : vector<8x128xi1>, vector<8x128xf32>
    %c0_12 = arith.constant 0 : index
    %c0_13 = arith.constant 0 : index
    %47 = vector.load %arg4[%c0_12, %c0_13] : memref<8x128xf32, #tpu.memory_space<vmem>>, vector<8x128xf32>
    tpu.vector_store %arg4[%c0_12, %c0_13], %46 {strides = array<i32>} : memref<8x128xf32, #tpu.memory_space<vmem>>, vector<8x128xf32>,
    return
  }
  func.func @transform_0(%arg0: i32) -> (i32, i32) {
    %c0_i32 = arith.constant 0 : i32
    %c0_i32_0 = arith.constant 0 : i32
    return %arg0, %c0_i32 : i32, i32
  }
  func.func @transform_1(%arg0: i32) -> (i32, i32) {
    %c0_i32 = arith.constant 0 : i32
    %c0_i32_0 = arith.constant 0 : i32
    %c0_i32_1 = arith.constant 0 : i32
    return %c0_i32, %c0_i32_0 : i32, i32
  }
  func.func @transform_2(%arg0: i32) -> (i32, i32) {
    %c0_i32 = arith.constant 0 : i32
    %c0_i32_0 = arith.constant 0 : i32
    %c0_i32_1 = arith.constant 0 : i32
    return %c0_i32, %c0_i32_0 : i32, i32
  }
  func.func @transform_3(%arg0: i32) -> (i32, i32) {
    %c0_i32 = arith.constant 0 : i32
    %c0_i32_0 = arith.constant 0 : i32
    return %arg0, %c0_i32 : i32, i32
  }
}

</mosaic_0001>

<bundles_post_ra>
// kernel: tpu_custom_call.1
= control target key start
LH: loop header
LB: loop body
LE: loop exit
PB: predicated region body
PF: predicated region fallthrough
CT: control target
= control target key end

     0   :  { %8 = vsyncpa [#allocation3], 0  ;;  %s451_s0 = inlined_call_operand.hbm [shape: bf16[2,128], index: 0, kind: input, shape index: {}]   ;;  %s452_s1 = inlined_call_operand.hbm [shape: bf16[128,128], index: 1, kind: input, shape index: {}]   ;;  %s453_s2 = inlined_call_operand.vmem [shape: f32[1,128], index: 2, kind: input, shape index: {}]   ;;  %s454_s3 = inlined_call_operand.hbm [shape: f32[2,128], index: 3, kind: output, shape index: {}]  }
   0x1   :  { %9 = vsyncpa [#allocation6], 0 }
   0x2   :  { %10 = vsyncpa [#allocation4], 0 }
   0x3   :  { %15 = vsyncadd [#allocation3], 48  ;;  %s377_s12 = smov [#allocation2]   ;;  %s305_s16 = scalar_lea.hbm %s451_s0, 16 }
   0x4   :  { %s16_s13 = sshll.u32 %s377_s12, 4  ;;  %p306_p0 = scmp.ne.s32.totalorder %s451_s0, %s305_s16  ;;  %s17_s13 = int_to_ptr.vmem [resolvable:$true] %s16_s13 }
   0x5   :  { %p309_p1 = scmp.lt.u32.totalorder %s305_s16, %s451_s0 }
   0x7   :  { %p311_p2 = pnand %p309_p1, %p306_p0 }
   0x9   :  { %314 = shalt.err (!%p311_p2)
}
   0xa   :  { %s315_s21 = scalar_lea.vmem %s17_s13, 16  ;;  %s319_s22 = scalar_lea.vmem %s17_s13, 64 }
   0xb   :  { %p316_p3 = scmp.ne.s32.totalorder %s17_s13, %s315_s21  ;;  %p320_p4 = scmp.lt.s32.totalorder %s17_s13, %s17_s13 }
   0xc   :  { %p321_p5 = scmp.lt.s32.totalorder %s319_s22, %s315_s21 }
   0xe   :  { %p322_p6 = por %p321_p5, %p320_p4 }
  0x10   :  { %p323_p7 = pnand %p322_p6, %p316_p3 }
  0x12   :  { %326 = shalt.err (!%p323_p7)
}
  0x13   :  { %s378_s23 = smov 16   ;;  %s379_s24 = smov 1  }
  0x14   :  { %22 = dma.hbm_to_vmem [thread:$0]  %s451_s0, 16, %s17_s13, [#allocation3], %s378_s23, %s378_s23, %s379_s24  }
  0x15   :  { %s380_s27 = smov [#allocation5]   ;;  %s327_s4 = scalar_lea.hbm %s452_s1, 1024 }
  0x16   :  { %s28_s28 = sshll.u32 %s380_s27, 4  ;;  %p328_p8 = scmp.ne.s32.totalorder %s452_s1, %s327_s4  ;;  %s29_s28 = int_to_ptr.vmem [resolvable:$true] %s28_s28 }
  0x17   :  { %p331_p9 = scmp.lt.u32.totalorder %s327_s4, %s452_s1 }
  0x19   :  { %p333_p10 = pnand %p331_p9, %p328_p8 }
  0x1b   :  { %336 = shalt.err (!%p333_p10)
}
  0x1c   :  { %s337_s9 = scalar_lea.vmem %s29_s28, 1024  ;;  %p342_p12 = scmp.lt.s32.totalorder %s29_s28, %s29_s28 }
  0x1d   :  { %p338_p11 = scmp.ne.s32.totalorder %s29_s28, %s337_s9  ;;  %p343_p13 = scmp.lt.s32.totalorder %s337_s9, %s337_s9 }
  0x1f   :  { %p344_p0 = por %p343_p13, %p342_p12 }
  0x21   :  { %p345_p1 = pnand %p344_p0, %p338_p11 }
  0x23   :  { %348 = shalt.err (!%p345_p1)
}
  0x24   :  { %s381_s0 = smov 64   ;;  %s382_s10 = smov 4  }
  0x25   :  { %34 = dma.hbm_to_vmem [thread:$0]  %s452_s1, 1024, %s29_s28, [#allocation6], %s381_s0, %s381_s0, %s382_s10  }
  0x26   :  { %371 = dma.done.wait [#allocation3], 64  }
  0x27   :  { %372 = vsyncadd [#allocation3], 4294967232 }
  0x28   :  { %373 = dma.done.wait [#allocation6], 1024  }
  0x29   :  { %374 = vsyncadd [#allocation6], 4294966272  ;;  %v383_v0 = vmov 0.0   ;;  %vm384_vm0 = vmmov 0   ;;  %v289_v1 = vld [vmem:[#allocation5] sm:$0xff]   ;;  %v290_v2 = vld [vmem:[#allocation5 + $0x8] sm:$0xff]   ;;  %v80_v6 = vlaneseq }
  0x2a   :  { %257 = vmatprep.subr.bf16.mxu0 %v383_v0  ;;  %273 = vmatprep.mubr.msk.bf16.mxu0 %vm384_vm0, %v383_v0  ;;  %v291_v3 = vld [vmem:[#allocation5 + $0x10] sm:$0xff]   ;;  %v385_v4 = vmov 1966171168   ;;  %v292_v7 = vld [vmem:[#allocation5 + $0x18] sm:$0xff]   ;;  %v293_v8 = vld [vmem:[#allocation5 + $0x20] sm:$0xff]  }
  0x2b   :  { %258 = vmatpush3.bf16.msra.mxu0 %v289_v1  ;;  %v78_v5 = vunpack.c.l.s4 %v385_v4  ;;  %v44_v9 = vld [vmem:[#allocation2] sm:$0x1]  ;;  %v81_v11 = vshrl.u32 %v80_v6, 7  ;;  %v45_v12 = vld [vmem:[#allocation2 + $0x1] sm:$0x1]  ;;  %v294_v18 = vld [vmem:[#allocation5 + $0x28] sm:$0xff]  }
  0x2c   :  { %259 = vmatprep.subr.bf16.mxu0 %v383_v0  ;;  %v46_v13 = vld [vmem:[#allocation2 + $0x2] sm:$0x1]  ;;  %v47_v14 = vld [vmem:[#allocation2 + $0x3] sm:$0x1]  ;;  %v75_v15 = vcombine.low %v44_v9, %v45_v12  ;;  %v295_v21 = vld [vmem:[#allocation5 + $0x30] sm:$0xff]   ;;  %v189_v25 = vand.u32 127, %v80_v6 }
  0x2d   :  { %v79_v10 = vunpack.c.0.s8 %v78_v5  ;;  %v76_v16 = vcombine.low %v46_v13, %v47_v14  ;;  %v296_v23 = vld [vmem:[#allocation5 + $0x38] sm:$0xff]  }
  0x2e   :  { %v238_v26 = vld [vmem:[%s453_s2] ss:$0 sm:$0xff]  ;;  %vm190_vm1 = vcmp.lt.s32.totalorder %v189_v25, 5  ;;  %vm191_vm2 = vcmp.ge.s32.totalorder %v189_v25, 55  ;;  %vm192_vm3 = vcmp.lt.s32.totalorder %v189_v25, 105 }
  0x2f   :  { %260 = vmatpush3.bf16.msra.mxu0 %v290_v2  ;;  %v82_v17 = vsub.s32 %v79_v10, %v81_v11  ;;  %vm193_vm4 = vmand %vm191_vm2, %vm192_vm3 }
  0x30   :  { %261 = vmatprep.subr.bf16.mxu0 %v383_v0 }
  0x31   :  { %v83_v19 = vrot.slane %v75_v15, %v82_v17  ;;  %v90_v20 = vrot.slane %v76_v16, %v82_v17 }
  0x33   :  { %262 = vmatpush3.bf16.msra.mxu0 %v291_v3  ;;  %v91_v22 = vcombine.low %v83_v19, %v90_v20 }
  0x34   :  { %263 = vmatprep.subr.bf16.mxu0 %v383_v0 }
  0x35   :  { %v98_v24 = vrot.slane %v91_v22, %v82_v17 }
  0x37   :  { %264 = vmatpush3.bf16.msra.mxu0 %v292_v7 }
  0x38   :  { %265 = vmatprep.subr.bf16.mxu0 %v383_v0 }
  0x3b   :  { %266 = vmatpush3.bf16.msra.mxu0 %v293_v8 }
  0x3c   :  { %267 = vmatprep.subr.bf16.mxu0 %v383_v0 }
  0x3f   :  { %268 = vmatpush3.bf16.msra.mxu0 %v294_v18 }
  0x40   :  { %269 = vmatprep.subr.bf16.mxu0 %v383_v0 }
  0x43   :  { %270 = vmatpush3.bf16.msra.mxu0 %v295_v21 }
  0x44   :  { %271 = vmatprep.subr.bf16.mxu0 %v383_v0 }
  0x47   :  { %272 = vmatpush3.bf16.msra.mxu0 %v296_v23 }
  0x4a   :  { %274 = vmatmul.mubr.bf16.vlgmr.msra.gmra.mrb[0].mxu0 %v98_v24 }
 0x11d   :  { %v182_v27 = vpop.f32.mrb[0].mxu0 }
 0x11e   :  { %v183_v28 = vadd.f32 %v238_v26, %v182_v27  ;;  %v275_v29 = vpop.f32.mrb[1].mxu0 }
 0x11f   :  { %v185_v30 = vpop.f32.mrb[2].mxu0 }
 0x120   :  { %v276_v31 = vpop.f32.mrb[3].mxu0  ;;  %v196_v32 = vsel %vm190_vm1, %v183_v28, -inf  ;;  %v247_v38 = vmul.f32 -1.442695, %v183_v28 }
 0x121   :  { %197 = vmax.xlane.f32.xlu0 %v196_v32 }
 0x1ae   :  { %v198_v33 = vpop.xlane.xlu0 %197 }
 0x1af   :  { %v199_v34 = vsub.f32 %v183_v28, %v198_v33 }
 0x1b1   :  { %v200_v35 = vsel %vm190_vm1, %v199_v34, -inf }
 0x1b2   :  { %v201_v36 = vmul.f32 1.442695, %v200_v35 }
 0x1b4   :  { %297 = vpow2.f32 %v201_v36 }
 0x1b5   :  { %299 = vpow2.f32 %v247_v38 }
 0x1be   :  { %v298_v37 = vpop.eup %297 }
 0x1bf   :  { %203 = vadd.xlane.f32.xlu0 %v298_v37  ;;  %v300_v39 = vpop.eup %299 }
 0x1c0   :  { %v210_v40 = vadd.f32 1.0, %v300_v39 }
 0x1c2   :  { %301 = vrcp.f32 %v210_v40 }
 0x1cc   :  { %v302_v42 = vpop.eup %301 }
 0x1cd   :  { %v213_v43 = vmul.f32 9.9999, %v302_v42 }
 0x1cf   :  { %v214_v44 = vadd.f32 0.0001, %v213_v43 }
 0x1d1   :  { %v217_v47 = vsel %vm193_vm4, %v214_v44, %v183_v28 }
 0x24c   :  { %v204_v41 = vpop.xlane.xlu0 %203 }
 0x24d   :  { %303 = vrcp.f32 %v204_v41 }
 0x257   :  { %v304_v45 = vpop.eup %303 }
 0x258   :  { %v206_v46 = vmul.f32 %v304_v45, %v298_v37 }
 0x25a   :  { %v218_v48 = vsel %vm190_vm1, %v206_v46, %v217_v47 }
 0x25b   :  { %219 = vst [vmem:[#allocation7] sm:$0xff] %v218_v48 }
 0x25c   :  { %224 = vsyncadd [#allocation4], 96  ;;  %s386_s2 = smov [#allocation7]  }
 0x25d   :  { %s225_s14 = sshll.u32 %s386_s2, 4  ;;  %s226_s14 = int_to_ptr.vmem [resolvable:$true] %s225_s14 }
 0x25e   :  { %s349_s15 = scalar_lea.vmem %s226_s14, 32  ;;  %s353_s16 = scalar_lea.vmem %s226_s14, 128 }
 0x25f   :  { %p350_p2 = scmp.ne.s32.totalorder %s226_s14, %s349_s15  ;;  %p354_p3 = scmp.lt.s32.totalorder %s226_s14, %s226_s14 }
 0x260   :  { %p355_p4 = scmp.lt.s32.totalorder %s353_s16, %s349_s15 }
 0x262   :  { %p356_p5 = por %p355_p4, %p354_p3 }
 0x264   :  { %p357_p6 = pnand %p356_p5, %p350_p2 }
 0x266   :  { %360 = shalt.err (!%p357_p6)
}
 0x267   :  { %s361_s19 = scalar_lea.hbm %s454_s3, 32 }
 0x268   :  { %p362_p7 = scmp.ne.s32.totalorder %s454_s3, %s361_s19  ;;  %p365_p8 = scmp.lt.u32.totalorder %s361_s19, %s454_s3 }
 0x26a   :  { %p367_p9 = pnand %p365_p8, %p362_p7 }
 0x26c   :  { %370 = shalt.err (!%p367_p9)
}
 0x26d   :  { %s387_s24 = smov 32   ;;  %s388_s25 = smov 2  }
 0x26e   :  { %231 = dma.vmem_to_hbm [thread:$0]  %s226_s14, 32, %s454_s3, [#allocation4], %s387_s24, %s387_s24, %s388_s25  }
 0x26f   :  { %375 = dma.done.wait [#allocation4], 128  }
 0x270   :  { %376 = vsyncadd [#allocation4], 4294967168 }
 0x271   :  { %235 = vsyncpa [#allocation3], 1 }
 0x272   :  { %236 = vsyncpa [#allocation6], 1 }
 0x273   :  { %237 = vsyncpa [#allocation4], 1 }

</bundles_post_ra>
